<compile_context>
chip_gen: v7x
topology: tpu7x:2x2x1
jax: 0.10.0
libtpu: 0.0.40
codegen_flags: <defaults>
</compile_context>

<pallas_src>
import math
from functools import partial

import jax
import jax.numpy as jnp
import numpy as np
from jax.experimental import pallas as pl
from jax.experimental.pallas import tpu as pltpu

LOG_STD_MAX = 2.0
LOG_STD_MIN = -20.0

HP = 128  # padded feature / hidden / per-head width (one full lane tile)


def _softplus(z):
    # numerically stable softplus, elementwise (VPU + EUP)
    return jnp.maximum(z, 0.0) + jnp.log1p(jnp.exp(-jnp.abs(z)))


def action_module_kernel(xe_ref, wt_ref, wh_ref, b_ref, out_ref):
    # xe_ref:  (Bp, 256)  f32   [x | eps] packed, lane-dense
    # wt_ref:  (384, 128) f32   [w1 | w2 | w3] stacked along rows
    # wh_ref:  (128, 256) f32   fused [wmu | wsg] head weight
    # b_ref:   (1, 640)   f32   [b1 | b2 | b3 | bmu | bsg]
    # out_ref: (Bp, 512)  f32   [mu | std | action | logp] lane-dense slab
    x = xe_ref[:, 0 * HP:1 * HP]
    eps = xe_ref[:, 1 * HP:2 * HP]

    b1 = b_ref[:, 0 * HP:1 * HP]
    b2 = b_ref[:, 1 * HP:2 * HP]
    b3 = b_ref[:, 2 * HP:3 * HP]
    bh = b_ref[:, 3 * HP:5 * HP]            # fused head bias (1, 256)

    # 3-layer MLP trunk, all f32, MXU accumulation in f32.
    h1 = jnp.maximum(
        jnp.dot(x, wt_ref[0 * HP:1 * HP, :],
                preferred_element_type=jnp.float32) + b1, 0.0)
    h2 = jnp.maximum(
        jnp.dot(h1, wt_ref[1 * HP:2 * HP, :],
                preferred_element_type=jnp.float32) + b2, 0.0)
    h3 = jnp.maximum(
        jnp.dot(h2, wt_ref[2 * HP:3 * HP, :],
                preferred_element_type=jnp.float32) + b3, 0.0)

    # Fused mu/sigma head: one (Bp,128)x(128,256) matmul, then static slices.
    head = jnp.dot(h3, wh_ref[...], preferred_element_type=jnp.float32) + bh
    mu = head[:, 0:HP]
    sigma = head[:, HP:2 * HP]

    log_std = jnp.clip(sigma, LOG_STD_MIN, LOG_STD_MAX)
    std = jnp.exp(log_std)
    inv_std = jnp.exp(-log_std)              # EUP; avoids a vector divide

    # rsample: mu + std * eps (eps supplied as a deterministic input)
    ga = mu + std * eps
    action = jnp.tanh(ga)

    # torch semantics: log_prob evaluated at gaussian_action[0] (row 0),
    # broadcast against the full-batch Normal(mu, std).
    ga0 = ga[0:1, :]
    z = (ga0 - mu) * inv_std
    logp = -0.5 * z * z - log_std - 0.5 * jnp.log(2.0 * jnp.pi)
    logp = logp - 2.0 * (jnp.log(2.0) - ga0 - _softplus(-2.0 * ga0))

    # Single lane-dense output slab: 4 full-lane (128-wide) stores.
    out_ref[:, 0 * HP:1 * HP] = mu
    out_ref[:, 1 * HP:2 * HP] = std
    out_ref[:, 2 * HP:3 * HP] = action
    out_ref[:, 3 * HP:4 * HP] = logp


def _pad2(a, rows, cols):
    return jnp.pad(a, ((0, rows - a.shape[0]), (0, cols - a.shape[1])))


def pack_params(params):
    """Build the packed/padded weight operands ONCE (hoisted out of forward)."""
    w_trunk = jnp.concatenate(
        [_pad2(params["w1"], HP, HP),
         _pad2(params["w2"], HP, HP),
         _pad2(params["w3"], HP, HP)], axis=0).astype(jnp.float32)      # (384,128)
    w_head = jnp.concatenate(
        [_pad2(params["wmu"], HP, HP),
         _pad2(params["wsg"], HP, HP)], axis=1).astype(jnp.float32)     # (128,256)
    b_all = jnp.concatenate(
        [_pad2(params["b1"], 1, HP),
         _pad2(params["b2"], 1, HP),
         _pad2(params["b3"], 1, HP),
         _pad2(params["bmu"], 1, HP),
         _pad2(params["bsg"], 1, HP)], axis=1).astype(jnp.float32)      # (1,640)
    return {"w_trunk": w_trunk, "w_head": w_head, "b_all": b_all}


@partial(jax.jit, static_argnames=("n_action",))
def action_module_forward(x, eps, packed, *, n_action):
    """x: (B, feature_extractor) f32, eps: (B, n_action) f32
    -> (mu, std, action, logp), each (B, n_action).
    The padding, pallas_call and output slicing all fuse under jit."""
    B = x.shape[0]
    A = n_action
    Bp = max(8, ((B + 7) // 8) * 8)          # f32 sublane tile is 8 rows

    # Single (Bp, 256) lane-dense input slab: [x | eps].
    xe = jnp.concatenate(
        [_pad2(x.astype(jnp.float32), Bp, HP),
         _pad2(eps.astype(jnp.float32), Bp, HP)], axis=1)               # (Bp,256)

    vmem = pl.BlockSpec(memory_space=pltpu.MemorySpace.VMEM)
    cost = pl.CostEstimate(
        flops=2 * Bp * (3 * HP * HP + HP * 2 * HP),
        transcendentals=3 * Bp * HP + 2 * HP,
        bytes_accessed=4 * (xe.size + packed["w_trunk"].size
                            + packed["w_head"].size + packed["b_all"].size
                            + Bp * 4 * HP),
    )

    out = pl.pallas_call(
        action_module_kernel,
        out_shape=jax.ShapeDtypeStruct((Bp, 4 * HP), jnp.float32),
        in_specs=[vmem] * 4,
        out_specs=vmem,
        cost_estimate=cost,
    )(xe, packed["w_trunk"], packed["w_head"], packed["b_all"])

    mu = out[:B, 0 * HP:0 * HP + A]
    std = out[:B, 1 * HP:1 * HP + A]
    action = out[:B, 2 * HP:2 * HP + A]
    logp = out[:B, 3 * HP:3 * HP + A]
    return mu, std, action, logp


def reference_forward(x, params, eps):
    """Pure-JAX f32 reference (matches the PyTorch forward, training mode)."""
    relu = lambda t: jnp.maximum(t, 0.0)
    h1 = relu(x @ params["w1"] + params["b1"])
    h2 = relu(h1 @ params["w2"] + params["b2"])
    h3 = relu(h2 @ params["w3"] + params["b3"])
    mu = h3 @ params["wmu"] + params["bmu"]
    sigma = h3 @ params["wsg"] + params["bsg"]
    log_std = jnp.clip(sigma, LOG_STD_MIN, LOG_STD_MAX)
    std = jnp.exp(log_std)
    ga = mu + std * eps
    action = jnp.tanh(ga)
    ga0 = ga[0:1, :]
    z = (ga0 - mu) / std
    logp = -0.5 * z * z - log_std - 0.5 * jnp.log(2.0 * jnp.pi)
    logp = logp - 2.0 * (jnp.log(2.0) - ga0 - jax.nn.softplus(-2.0 * ga0))
    return mu, std, action, logp


def init_linear(key, fan_in, fan_out):
    # PyTorch nn.Linear default init: U(-1/sqrt(fan_in), 1/sqrt(fan_in))
    kw, kb = jax.random.split(key)
    bound = 1.0 / math.sqrt(fan_in)
    w = jax.random.uniform(kw, (fan_in, fan_out), jnp.float32, -bound, bound)
    b = jax.random.uniform(kb, (1, fan_out), jnp.float32, -bound, bound)
    return w, b


if __name__ == "__main__":
    # args implied by the module (small, deterministic)
    n_hidden = 32
    n_rnn_layers = 1
    rnn_directions = 1
    n_handcrafted_features = 4
    use_handcraft = 1
    n_action = 2

    feature_extractor = (n_hidden * n_rnn_layers * rnn_directions
                         + n_handcrafted_features * use_handcraft)   # 36
    last_hidden = feature_extractor * 2                              # 72
    batch = 2

    root = jax.random.PRNGKey(0)
    keys = jax.random.split(root, 8)

    w1, b1 = init_linear(keys[0], feature_extractor, last_hidden)
    w2, b2 = init_linear(keys[1], last_hidden, last_hidden)
    w3, b3 = init_linear(keys[2], last_hidden, last_hidden)
    wmu, bmu = init_linear(keys[3], last_hidden, n_action)
    wsg, bsg = init_linear(keys[4], last_hidden, n_action)
    params = dict(w1=w1, b1=b1, w2=w2, b2=b2, w3=w3, b3=b3,
                  wmu=wmu, bmu=bmu, wsg=wsg, bsg=bsg)

    # packed operands are built once (init-time), not per forward call
    packed = jax.tree_util.tree_map(jax.block_until_ready, pack_params(params))

    x = jax.random.normal(keys[5], (batch, feature_extractor), jnp.float32)
    eps = jax.random.normal(keys[6], (batch, n_action), jnp.float32)

    mu, action_std, action, logp_pi = action_module_forward(
        x, eps, packed, n_action=n_action)
    jax.block_until_ready((mu, action_std, action, logp_pi))

    assert mu.shape == (batch, n_action)
    assert action_std.shape == (batch, n_action)
    assert action.shape == (batch, n_action)
    assert logp_pi.shape == (batch, n_action)

    # sanity vs. pure-JAX f32 reference (kernel is now f32 end-to-end)
    r_mu, r_std, r_act, r_logp = reference_forward(x, params, eps)
    np.testing.assert_allclose(np.asarray(mu), np.asarray(r_mu), rtol=1e-2, atol=1e-2)
    np.testing.assert_allclose(np.asarray(action_std), np.asarray(r_std), rtol=1e-2, atol=1e-2)
    np.testing.assert_allclose(np.asarray(action), np.asarray(r_act), rtol=1e-2, atol=1e-2)
    np.testing.assert_allclose(np.asarray(logp_pi), np.asarray(r_logp), rtol=1e-2, atol=1e-2)

    print("KERNEL_OK")
</pallas_src>

<mosaic_0001>
module attributes {stable_mosaic.version = 11 : i64} {
  func.func @action_module_kernel(%arg0: memref<8x256xf32, #tpu.memory_space<vmem>>, %arg1: memref<384x128xf32, #tpu.memory_space<vmem>>, %arg2: memref<128x256xf32, #tpu.memory_space<vmem>>, %arg3: memref<1x640xf32, #tpu.memory_space<vmem>>, %arg4: memref<8x512xf32, #tpu.memory_space<vmem>>) attributes {dimension_semantics = [], scalar_prefetch = 0 : i64, scratch_operands = 0 : i64, tpu.core_type = #tpu.core_type<tc>} {
    %c0 = arith.constant 0 : index
    %c0_0 = arith.constant 0 : index
    %0 = vector.load %arg0[%c0, %c0_0] : memref<8x256xf32, #tpu.memory_space<vmem>>, vector<8x128xf32>
    %c0_1 = arith.constant 0 : index
    %c128 = arith.constant 128 : index
    %1 = vector.load %arg0[%c0_1, %c128] : memref<8x256xf32, #tpu.memory_space<vmem>>, vector<8x128xf32>
    %c0_2 = arith.constant 0 : index
    %c0_3 = arith.constant 0 : index
    %2 = vector.load %arg3[%c0_2, %c0_3] : memref<1x640xf32, #tpu.memory_space<vmem>>, vector<1x128xf32>
    %c0_4 = arith.constant 0 : index
    %c128_5 = arith.constant 128 : index
    %3 = vector.load %arg3[%c0_4, %c128_5] : memref<1x640xf32, #tpu.memory_space<vmem>>, vector<1x128xf32>
    %c0_6 = arith.constant 0 : index
    %c256 = arith.constant 256 : index
    %4 = vector.load %arg3[%c0_6, %c256] : memref<1x640xf32, #tpu.memory_space<vmem>>, vector<1x128xf32>
    %c0_7 = arith.constant 0 : index
    %c384 = arith.constant 384 : index
    %5 = vector.load %arg3[%c0_7, %c384] : memref<1x640xf32, #tpu.memory_space<vmem>>, vector<1x256xf32>
    %c0_8 = arith.constant 0 : index
    %c0_9 = arith.constant 0 : index
    %6 = vector.load %arg1[%c0_8, %c0_9] : memref<384x128xf32, #tpu.memory_space<vmem>>, vector<128x128xf32>
    %cst = arith.constant dense<0.000000e+00> : vector<8x128xf32>
    %7 = tpu.matmul %0, %6, %cst {dimension_numbers = #tpu.dot_dimension_numbers<[1], [0], [0], [1], [0, 0, 1, 1], [], []>} : vector<8x128xf32>, vector<128x128xf32>, vector<8x128xf32> -> vector<8x128xf32>
    %8 = vector.broadcast %2 : vector<1x128xf32> to vector<8x128xf32>
    %9 = arith.addf %7, %8 : vector<8x128xf32>
    %cst_10 = arith.constant 0.000000e+00 : f32
    %10 = vector.broadcast %cst_10 : f32 to vector<8x128xf32>
    %11 = arith.maximumf %9, %10 : vector<8x128xf32>
    %c128_11 = arith.constant 128 : index
    %c0_12 = arith.constant 0 : index
    %12 = vector.load %arg1[%c128_11, %c0_12] : memref<384x128xf32, #tpu.memory_space<vmem>>, vector<128x128xf32>
    %cst_13 = arith.constant dense<0.000000e+00> : vector<8x128xf32>
    %13 = tpu.matmul %11, %12, %cst_13 {dimension_numbers = #tpu.dot_dimension_numbers<[1], [0], [0], [1], [0, 0, 1, 1], [], []>} : vector<8x128xf32>, vector<128x128xf32>, vector<8x128xf32> -> vector<8x128xf32>
    %14 = vector.broadcast %3 : vector<1x128xf32> to vector<8x128xf32>
    %15 = arith.addf %13, %14 : vector<8x128xf32>
    %cst_14 = arith.constant 0.000000e+00 : f32
    %16 = vector.broadcast %cst_14 : f32 to vector<8x128xf32>
    %17 = arith.maximumf %15, %16 : vector<8x128xf32>
    %c256_15 = arith.constant 256 : index
    %c0_16 = arith.constant 0 : index
    %18 = vector.load %arg1[%c256_15, %c0_16] : memref<384x128xf32, #tpu.memory_space<vmem>>, vector<128x128xf32>
    %cst_17 = arith.constant dense<0.000000e+00> : vector<8x128xf32>
    %19 = tpu.matmul %17, %18, %cst_17 {dimension_numbers = #tpu.dot_dimension_numbers<[1], [0], [0], [1], [0, 0, 1, 1], [], []>} : vector<8x128xf32>, vector<128x128xf32>, vector<8x128xf32> -> vector<8x128xf32>
    %20 = vector.broadcast %4 : vector<1x128xf32> to vector<8x128xf32>
    %21 = arith.addf %19, %20 : vector<8x128xf32>
    %cst_18 = arith.constant 0.000000e+00 : f32
    %22 = vector.broadcast %cst_18 : f32 to vector<8x128xf32>
    %23 = arith.maximumf %21, %22 : vector<8x128xf32>
    %c0_19 = arith.constant 0 : index
    %c0_20 = arith.constant 0 : index
    %24 = vector.load %arg2[%c0_19, %c0_20] : memref<128x256xf32, #tpu.memory_space<vmem>>, vector<128x256xf32>
    %cst_21 = arith.constant dense<0.000000e+00> : vector<8x256xf32>
    %25 = tpu.matmul %23, %24, %cst_21 {dimension_numbers = #tpu.dot_dimension_numbers<[1], [0], [0], [1], [0, 0, 1, 1], [], []>} : vector<8x128xf32>, vector<128x256xf32>, vector<8x256xf32> -> vector<8x256xf32>
    %26 = vector.broadcast %5 : vector<1x256xf32> to vector<8x256xf32>
    %27 = arith.addf %25, %26 : vector<8x256xf32>
    %28 = vector.extract_strided_slice %27 {offsets = [0, 0], sizes = [8, 128], strides = [1, 1]} : vector<8x256xf32> to vector<8x128xf32>
    %29 = vector.extract_strided_slice %27 {offsets = [0, 128], sizes = [8, 128], strides = [1, 1]} : vector<8x256xf32> to vector<8x128xf32>
    %cst_22 = arith.constant -2.000000e+01 : f32
    %cst_23 = arith.constant 2.000000e+00 : f32
    %30 = vector.broadcast %cst_22 : f32 to vector<8x128xf32>
    %31 = arith.maximumf %30, %29 : vector<8x128xf32>
    %32 = vector.broadcast %cst_23 : f32 to vector<8x128xf32>
    %33 = arith.minimumf %32, %31 : vector<8x128xf32>
    %34 = math.exp %33 : vector<8x128xf32>
    %cst_24 = arith.constant 0.000000e+00 : f32
    %35 = vector.broadcast %cst_24 : f32 to vector<8x128xf32>
    %36 = arith.subf %35, %33 : vector<8x128xf32>
    %37 = math.exp %36 : vector<8x128xf32>
    %38 = arith.mulf %34, %1 : vector<8x128xf32>
    %39 = arith.addf %28, %38 : vector<8x128xf32>
    %40 = math.tanh %39 : vector<8x128xf32>
    %41 = vector.extract_strided_slice %39 {offsets = [0, 0], sizes = [1, 128], strides = [1, 1]} : vector<8x128xf32> to vector<1x128xf32>
    %42 = vector.broadcast %41 : vector<1x128xf32> to vector<8x128xf32>
    %43 = arith.subf %42, %28 : vector<8x128xf32>
    %44 = arith.mulf %43, %37 : vector<8x128xf32>
    %cst_25 = arith.constant -5.000000e-01 : f32
    %45 = vector.broadcast %cst_25 : f32 to vector<8x128xf32>
    %46 = arith.mulf %45, %44 : vector<8x128xf32>
    %47 = arith.mulf %46, %44 : vector<8x128xf32>
    %48 = arith.subf %47, %33 : vector<8x128xf32>
    %cst_26 = arith.constant 6.28318548 : f32
    %49 = math.log %cst_26 : f32
    %cst_27 = arith.constant 5.000000e-01 : f32
    %50 = arith.mulf %cst_27, %49 : f32
    %51 = vector.broadcast %50 : f32 to vector<8x128xf32>
    %52 = arith.subf %48, %51 : vector<8x128xf32>
    %cst_28 = arith.constant 2.000000e+00 : f32
    %53 = math.log %cst_28 : f32
    %54 = vector.broadcast %53 : f32 to vector<1x128xf32>
    %55 = arith.subf %54, %41 : vector<1x128xf32>
    %cst_29 = arith.constant -2.000000e+00 : f32
    %56 = vector.broadcast %cst_29 : f32 to vector<1x128xf32>
    %57 = arith.mulf %56, %41 : vector<1x128xf32>
    %cst_30 = arith.constant 0.000000e+00 : f32
    %58 = vector.broadcast %cst_30 : f32 to vector<1x128xf32>
    %59 = arith.maximumf %57, %58 : vector<1x128xf32>
    %60 = math.absf %57 : vector<1x128xf32>
    %cst_31 = arith.constant 0.000000e+00 : f32
    %61 = vector.broadcast %cst_31 : f32 to vector<1x128xf32>
    %62 = arith.subf %61, %60 : vector<1x128xf32>
    %63 = math.exp %62 : vector<1x128xf32>
    %64 = math.log1p %63 : vector<1x128xf32>
    %65 = arith.addf %59, %64 : vector<1x128xf32>
    %66 = arith.subf %55, %65 : vector<1x128xf32>
    %cst_32 = arith.constant 2.000000e+00 : f32
    %67 = vector.broadcast %cst_32 : f32 to vector<1x128xf32>
    %68 = arith.mulf %67, %66 : vector<1x128xf32>
    %69 = vector.broadcast %68 : vector<1x128xf32> to vector<8x128xf32>
    %70 = arith.subf %52, %69 : vector<8x128xf32>
    %c0_33 = arith.constant 0 : index
    %c0_34 = arith.constant 0 : index
    %71 = vector.load %arg4[%c0_33, %c0_34] : memref<8x512xf32, #tpu.memory_space<vmem>>, vector<8x128xf32>
    tpu.vector_store %arg4[%c0_33, %c0_34], %28 {strides = array<i32>} : memref<8x512xf32, #tpu.memory_space<vmem>>, vector<8x128xf32>,
    %c0_35 = arith.constant 0 : index
    %c128_36 = arith.constant 128 : index
    %72 = vector.load %arg4[%c0_35, %c128_36] : memref<8x512xf32, #tpu.memory_space<vmem>>, vector<8x128xf32>
    tpu.vector_store %arg4[%c0_35, %c128_36], %34 {strides = array<i32>} : memref<8x512xf32, #tpu.memory_space<vmem>>, vector<8x128xf32>,
    %c0_37 = arith.constant 0 : index
    %c256_38 = arith.constant 256 : index
    %73 = vector.load %arg4[%c0_37, %c256_38] : memref<8x512xf32, #tpu.memory_space<vmem>>, vector<8x128xf32>
    tpu.vector_store %arg4[%c0_37, %c256_38], %40 {strides = array<i32>} : memref<8x512xf32, #tpu.memory_space<vmem>>, vector<8x128xf32>,
    %c0_39 = arith.constant 0 : index
    %c384_40 = arith.constant 384 : index
    %74 = vector.load %arg4[%c0_39, %c384_40] : memref<8x512xf32, #tpu.memory_space<vmem>>, vector<8x128xf32>
    tpu.vector_store %arg4[%c0_39, %c384_40], %70 {strides = array<i32>} : memref<8x512xf32, #tpu.memory_space<vmem>>, vector<8x128xf32>,
    return
  }
}

</mosaic_0001>

<bundles_post_ra>
// kernel: action_module_forward.1
= control target key start
LH: loop header
LB: loop body
LE: loop exit
PB: predicated region body
PF: predicated region fallthrough
CT: control target
= control target key end

     0   :  { %9 = vsyncpa [#allocation3], 0  ;;  %s948_s0 = inlined_call_operand.vmem [shape: f32[8,256], index: 0, kind: input, shape index: {}]   ;;  %s949_s1 = inlined_call_operand.hbm [shape: f32[384,128], index: 1, kind: input, shape index: {}]   ;;  %s950_s2 = inlined_call_operand.hbm [shape: f32[128,256], index: 2, kind: input, shape index: {}]   ;;  %s951_s3 = inlined_call_operand.vmem [shape: f32[1,640], index: 3, kind: input, shape index: {}]   ;;  %s952_s4 = inlined_call_operand.vmem [shape: f32[8,512], index: 4, kind: output, shape index: {}]  }
   0x1   :  { %10 = vsyncpa [#allocation5], 0  ;;  %s829_s15 = smov [#allocation2]   ;;  %s781_s19 = scalar_lea.hbm %s949_s1, 6144 }
   0x2   :  { %s18_s16 = sshll.u32 %s829_s15, 4  ;;  %p782_p0 = scmp.ne.s32.totalorder %s949_s1, %s781_s19  ;;  %s19_s16 = int_to_ptr.vmem [resolvable:$true] %s18_s16 }
   0x3   :  { %p785_p1 = scmp.lt.u32.totalorder %s781_s19, %s949_s1 }
   0x5   :  { %p787_p2 = pnand %p785_p1, %p782_p0 }
   0x7   :  { %790 = shalt.err (!%p787_p2)
}
   0x8   :  { %s791_s24 = scalar_lea.vmem %s19_s16, 6144  ;;  %p796_p4 = scmp.lt.s32.totalorder %s19_s16, %s19_s16 }
   0x9   :  { %p792_p3 = scmp.ne.s32.totalorder %s19_s16, %s791_s24  ;;  %p797_p5 = scmp.lt.s32.totalorder %s791_s24, %s791_s24 }
   0xb   :  { %p798_p6 = por %p797_p5, %p796_p4 }
   0xd   :  { %p799_p7 = pnand %p798_p6, %p792_p3 }
   0xf   :  { %802 = shalt.err (!%p799_p7)
}
  0x10   :  { %s830_s25 = smov 128   ;;  %s831_s26 = smov 8  }
  0x11   :  { %24 = dma.hbm_to_vmem [thread:$0]  %s949_s1, 6144, %s19_s16, [#allocation3], %s830_s25, %s830_s25, %s831_s26  }
  0x12   :  { %s832_s29 = smov [#allocation4]   ;;  %s803_s7 = scalar_lea.hbm %s950_s2, 4096 }
  0x13   :  { %s30_s30 = sshll.u32 %s832_s29, 4  ;;  %p804_p8 = scmp.ne.s32.totalorder %s950_s2, %s803_s7  ;;  %s31_s30 = int_to_ptr.vmem [resolvable:$true] %s30_s30 }
  0x14   :  { %p807_p9 = scmp.lt.u32.totalorder %s803_s7, %s950_s2 }
  0x16   :  { %p809_p10 = pnand %p807_p9, %p804_p8 }
  0x18   :  { %812 = shalt.err (!%p809_p10)
}
  0x19   :  { %s813_s12 = scalar_lea.vmem %s31_s30, 4096  ;;  %p818_p12 = scmp.lt.s32.totalorder %s31_s30, %s31_s30 }
  0x1a   :  { %p814_p11 = scmp.ne.s32.totalorder %s31_s30, %s813_s12  ;;  %p819_p13 = scmp.lt.s32.totalorder %s813_s12, %s813_s12 }
  0x1c   :  { %p820_p0 = por %p819_p13, %p818_p12 }
  0x1e   :  { %p821_p1 = pnand %p820_p0, %p814_p11 }
  0x20   :  { %824 = shalt.err (!%p821_p1)
}
  0x21   :  { %s833_s1 = smov 256   ;;  %s834_s13 = smov 16  }
  0x22   :  { %36 = dma.hbm_to_vmem [thread:$0]  %s950_s2, 4096, %s31_s30, [#allocation5], %s833_s1, %s833_s1, %s834_s13  }
  0x23   :  { %825 = dma.done.wait [#allocation3], 6144  }
  0x24   :  { %826 = vsyncadd [#allocation3], 4294961152 }
  0x25   :  { %827 = dma.done.wait [#allocation5], 4096  }
  0x26   :  { %828 = vsyncadd [#allocation5], 4294963200  ;;  %v835_v0 = vmov 0.0|0.0   ;;  %vm836_vm0 = vmmov 0   ;;  %v837_v1 = vmov 0.0   ;;  %v51_v2 = vld [vmem:[#allocation2] sm:$0xff] }
  0x27   :  { %658 = vmatprep.subr.bf16.mxu0 %v835_v0  ;;  %585 = vmatprep.mubr.msk.f32.mxu0 %vm836_vm0, %v837_v1  ;;  %v52_v3 = vld [vmem:[#allocation2 + $0x8] sm:$0xff]  ;;  %v53_v4 = vld [vmem:[#allocation2 + $0x10] sm:$0xff]  ;;  %v54_v6 = vld [vmem:[#allocation2 + $0x18] sm:$0xff] }
  0x28   :  { %682 = vmatprep.subr.bf16.mxu1 %v835_v0  ;;  %620 = vmatprep.mubr.msk.f32.mxu1 %vm836_vm0, %v837_v1  ;;  %v659_v5 = vpack.c.bf16 %v52_v3, %v51_v2  ;;  %v662_v7 = vpack.c.bf16 %v54_v6, %v53_v4  ;;  %v55_v8 = vld [vmem:[#allocation2 + $0x20] sm:$0xff]  ;;  %v56_v9 = vld [vmem:[#allocation2 + $0x28] sm:$0xff]  ;;  %v146_v12 = vld [vmem:[#allocation2 + $0x90] sm:$0xff] }
  0x29   :  { %v144_v10 = vld [vmem:[#allocation2 + $0x80] sm:$0xff]  ;;  %v145_v11 = vld [vmem:[#allocation2 + $0x88] sm:$0xff]  ;;  %v147_v13 = vld [vmem:[#allocation2 + $0x98] sm:$0xff]  ;;  %v665_v14 = vpack.c.bf16 %v56_v9, %v55_v8 }
  0x2a   :  { %660 = vmatpush3.bf16.msra.mxu0 %v659_v5  ;;  %v683_v15 = vpack.c.bf16 %v145_v11, %v144_v10  ;;  %v57_v16 = vld [vmem:[#allocation2 + $0x30] sm:$0xff]  ;;  %v58_v17 = vld [vmem:[#allocation2 + $0x38] sm:$0xff]  ;;  %v686_v18 = vpack.c.bf16 %v147_v13, %v146_v12  ;;  %v148_v19 = vld [vmem:[#allocation2 + $0xa0] sm:$0xff] }
  0x2b   :  { %661 = vmatprep.subr.bf16.mxu0 %v835_v0  ;;  %v149_v20 = vld [vmem:[#allocation2 + $0xa8] sm:$0xff]  ;;  %v668_v21 = vpack.c.bf16 %v58_v17, %v57_v16  ;;  %v59_v22 = vld [vmem:[#allocation2 + $0x40] sm:$0xff]  ;;  %v150_v25 = vld [vmem:[#allocation2 + $0xb0] sm:$0xff] }
  0x2c   :  { %684 = vmatpush3.bf16.msra.mxu1 %v683_v15  ;;  %v60_v23 = vld [vmem:[#allocation2 + $0x48] sm:$0xff]  ;;  %v689_v24 = vpack.c.bf16 %v149_v20, %v148_v19  ;;  %v151_v26 = vld [vmem:[#allocation2 + $0xb8] sm:$0xff]  ;;  %v61_v28 = vld [vmem:[#allocation2 + $0x50] sm:$0xff] }
  0x2d   :  { %685 = vmatprep.subr.bf16.mxu1 %v835_v0  ;;  %v671_v27 = vpack.c.bf16 %v60_v23, %v59_v22  ;;  %v62_v29 = vld [vmem:[#allocation2 + $0x58] sm:$0xff]  ;;  %v692_v30 = vpack.c.bf16 %v151_v26, %v150_v25  ;;  %v152_v31 = vld [vmem:[#allocation2 + $0xc0] sm:$0xff]  ;;  %v153_v32 = vld [vmem:[#allocation2 + $0xc8] sm:$0xff] }
  0x2e   :  { %663 = vmatpush3.bf16.msra.mxu0 %v662_v7  ;;  %v674_v33 = vpack.c.bf16 %v62_v29, %v61_v28  ;;  %v63_v34 = vld [vmem:[#allocation2 + $0x60] sm:$0xff]  ;;  %v64_v35 = vld [vmem:[#allocation2 + $0x68] sm:$0xff]  ;;  %v695_v36 = vpack.c.bf16 %v153_v32, %v152_v31  ;;  %v154_v37 = vld [vmem:[#allocation2 + $0xd0] sm:$0xff] }
  0x2f   :  { %664 = vmatprep.subr.bf16.mxu0 %v835_v0  ;;  %v155_v38 = vld [vmem:[#allocation2 + $0xd8] sm:$0xff]  ;;  %v677_v39 = vpack.c.bf16 %v64_v35, %v63_v34  ;;  %v65_v40 = vld [vmem:[#allocation2 + $0x70] sm:$0xff]  ;;  %v156_v43 = vld [vmem:[#allocation2 + $0xe0] sm:$0xff] }
  0x30   :  { %687 = vmatpush3.bf16.msra.mxu1 %v686_v18  ;;  %v66_v41 = vld [vmem:[#allocation2 + $0x78] sm:$0xff]  ;;  %v698_v42 = vpack.c.bf16 %v155_v38, %v154_v37  ;;  %v157_v44 = vld [vmem:[#allocation2 + $0xe8] sm:$0xff]  ;;  %v45_v47 = vld [vmem:[%s948_s0] sm:$0xff] }
  0x31   :  { %688 = vmatprep.subr.bf16.mxu1 %v835_v0  ;;  %v680_v45 = vpack.c.bf16 %v66_v41, %v65_v40  ;;  %v701_v46 = vpack.c.bf16 %v157_v44, %v156_v43  ;;  %v158_v48 = vld [vmem:[#allocation2 + $0xf0] sm:$0xff]  ;;  %v159_v49 = vld [vmem:[#allocation2 + $0xf8] sm:$0xff]  ;;  %v237_v51 = vld [vmem:[#allocation2 + $0x100] sm:$0xff] }
  0x32   :  { %666 = vmatpush3.bf16.msra.mxu0 %v665_v14  ;;  %v704_v50 = vpack.c.bf16 %v159_v49, %v158_v48  ;;  %v238_v52 = vld [vmem:[#allocation2 + $0x108] sm:$0xff]  ;;  %v239_v53 = vld [vmem:[#allocation2 + $0x110] sm:$0xff]  ;;  %v240_v55 = vld [vmem:[#allocation2 + $0x118] sm:$0xff] }
  0x33   :  { %667 = vmatprep.subr.bf16.mxu0 %v835_v0  ;;  %v707_v54 = vpack.c.bf16 %v238_v52, %v237_v51  ;;  %v710_v56 = vpack.c.bf16 %v240_v55, %v239_v53  ;;  %v241_v57 = vld [vmem:[#allocation2 + $0x120] sm:$0xff]  ;;  %v242_v58 = vld [vmem:[#allocation2 + $0x128] sm:$0xff]  ;;  %v243_v60 = vld [vmem:[#allocation2 + $0x130] sm:$0xff] }
  0x34   :  { %690 = vmatpush3.bf16.msra.mxu1 %v689_v24  ;;  %v713_v59 = vpack.c.bf16 %v242_v58, %v241_v57  ;;  %v244_v61 = vld [vmem:[#allocation2 + $0x138] sm:$0xff]  ;;  %v245_v63 = vld [vmem:[#allocation2 + $0x140] sm:$0xff]  ;;  %v246_v2 = vld [vmem:[#allocation2 + $0x148] sm:$0xff] }
  0x35   :  { %691 = vmatprep.subr.bf16.mxu1 %v835_v0  ;;  %v716_v62 = vpack.c.bf16 %v244_v61, %v243_v60  ;;  %v719_v3 = vpack.c.bf16 %v246_v2, %v245_v63  ;;  %v247_v4 = vld [vmem:[#allocation2 + $0x150] sm:$0xff]  ;;  %v248_v5 = vld [vmem:[#allocation2 + $0x158] sm:$0xff]  ;;  %v249_v7 = vld [vmem:[#allocation2 + $0x160] sm:$0xff] }
  0x36   :  { %669 = vmatpush3.bf16.msra.mxu0 %v668_v21  ;;  %v722_v6 = vpack.c.bf16 %v248_v5, %v247_v4  ;;  %v250_v8 = vld [vmem:[#allocation2 + $0x168] sm:$0xff]  ;;  %v498_v10 = vld [vmem:[%s951_s3] ss:$0 sm:$0xff]  ;;  %v251_v15 = vld [vmem:[#allocation2 + $0x170] sm:$0xff] }
  0x37   :  { %670 = vmatprep.subr.bf16.mxu0 %v835_v0  ;;  %v725_v9 = vpack.c.bf16 %v250_v8, %v249_v7  ;;  %v252_v16 = vld [vmem:[#allocation2 + $0x178] sm:$0xff]  ;;  %v331_v18 = vld [vmem:[#allocation4 + $0x8] sm:$0xff]  ;;  %v330_v20 = vld [vmem:[#allocation4] sm:$0xff] }
  0x38   :  { %693 = vmatpush3.bf16.msra.mxu1 %v692_v30  ;;  %v728_v17 = vpack.c.bf16 %v252_v16, %v251_v15  ;;  %v333_v19 = vld [vmem:[#allocation4 + $0x18] sm:$0xff]  ;;  %v335_v22 = vld [vmem:[#allocation4 + $0x28] sm:$0xff]  ;;  %v334_v26 = vld [vmem:[#allocation4 + $0x20] sm:$0xff] }
  0x39   :  { %694 = vmatprep.subr.bf16.mxu1 %v835_v0  ;;  %v730_v21 = vpack.c.bf16 %v333_v19, %v331_v18  ;;  %v337_v23 = vld [vmem:[#allocation4 + $0x38] sm:$0xff]  ;;  %v339_v28 = vld [vmem:[#allocation4 + $0x48] sm:$0xff]  ;;  %v338_v31 = vld [vmem:[#allocation4 + $0x40] sm:$0xff] }
  0x3a   :  { %672 = vmatpush3.bf16.msra.mxu0 %v671_v27  ;;  %v734_v25 = vpack.c.bf16 %v337_v23, %v335_v22  ;;  %v336_v27 = vld [vmem:[#allocation4 + $0x30] sm:$0xff]  ;;  %v341_v29 = vld [vmem:[#allocation4 + $0x58] sm:$0xff]  ;;  %v342_v37 = vld [vmem:[#allocation4 + $0x60] sm:$0xff] }
  0x3b   :  { %673 = vmatprep.subr.bf16.mxu0 %v835_v0  ;;  %v738_v30 = vpack.c.bf16 %v341_v29, %v339_v28  ;;  %v340_v32 = vld [vmem:[#allocation4 + $0x50] sm:$0xff]  ;;  %v345_v34 = vld [vmem:[#allocation4 + $0x78] sm:$0xff]  ;;  %v346_v43 = vld [vmem:[#allocation4 + $0x80] sm:$0xff] }
  0x3c   :  { %696 = vmatpush3.bf16.msra.mxu1 %v695_v36  ;;  %v740_v35 = vpack.c.bf16 %v340_v32, %v338_v31  ;;  %v344_v38 = vld [vmem:[#allocation4 + $0x70] sm:$0xff]  ;;  %v349_v40 = vld [vmem:[#allocation4 + $0x98] sm:$0xff]  ;;  %v350_v49 = vld [vmem:[#allocation4 + $0xa0] sm:$0xff] }
  0x3d   :  { %697 = vmatprep.subr.bf16.mxu1 %v835_v0  ;;  %v744_v41 = vpack.c.bf16 %v344_v38, %v342_v37  ;;  %v348_v44 = vld [vmem:[#allocation4 + $0x90] sm:$0xff]  ;;  %v355_v51 = vld [vmem:[#allocation4 + $0xc8] sm:$0xff]  ;;  %v357_v52 = vld [vmem:[#allocation4 + $0xd8] sm:$0xff] }
  0x3e   :  { %675 = vmatpush3.bf16.msra.mxu0 %v674_v33  ;;  %v343_v33 = vld [vmem:[#allocation4 + $0x68] sm:$0xff]  ;;  %v354_v55 = vld [vmem:[#allocation4 + $0xc0] sm:$0xff]  ;;  %v361_v2 = vld [vmem:[#allocation4 + $0xf8] sm:$0xff] }
  0x3f   :  { %676 = vmatprep.subr.bf16.mxu0 %v835_v0  ;;  %v742_v36 = vpack.c.bf16 %v345_v34, %v343_v33  ;;  %v499_v58 = vld [vmem:[%s951_s3 + $0x1] ss:$0 sm:$0xff]  ;;  %v359_v63 = vld [vmem:[#allocation4 + $0xe8] sm:$0xff]  ;;  %v360_v5 = vld [vmem:[#allocation4 + $0xf0] sm:$0xff] }
  0x40   :  { %699 = vmatpush3.bf16.msra.mxu1 %v698_v42  ;;  %v358_v4 = vld [vmem:[#allocation4 + $0xe0] sm:$0xff] }
  0x41   :  { %700 = vmatprep.subr.bf16.mxu1 %v835_v0  ;;  %v500_v7 = vld [vmem:[%s951_s3 + $0x2] ss:$0 sm:$0xff]  ;;  %v50_v15 = vld [vmem:[%s951_s3 + $0x3] sm:$0x3] }
  0x42   :  { %678 = vmatpush3.bf16.msra.mxu0 %v677_v39  ;;  %v347_v39 = vld [vmem:[#allocation4 + $0x88] sm:$0xff] }
  0x43   :  { %679 = vmatprep.subr.bf16.mxu0 %v835_v0  ;;  %v746_v42 = vpack.c.bf16 %v349_v40, %v347_v39 }
  0x44   :  { %702 = vmatpush3.bf16.msra.mxu1 %v701_v46  ;;  %v353_v46 = vld [vmem:[#allocation4 + $0xb8] sm:$0xff] }
  0x45   :  { %703 = vmatprep.subr.bf16.mxu1 %v835_v0 }
  0x46   :  { %681 = vmatpush3.bf16.msra.mxu0 %v680_v45  ;;  %v351_v45 = vld [vmem:[#allocation4 + $0xa8] sm:$0xff] }
  0x47   :  { %706 = vmatprep.subr.bf16.mxu0 %v835_v0  ;;  %v750_v48 = vpack.c.bf16 %v353_v46, %v351_v45 }
  0x48   :  { %705 = vmatpush3.bf16.msra.mxu1 %v704_v50  ;;  %v352_v50 = vld [vmem:[#allocation4 + $0xb0] sm:$0xff] }
  0x49   :  { %586 = vmatmul.mubr.f32.vlgmr.msra.gmra.mrb[0].mxu0 %v45_v47  ;;  %731 = vmatprep.subr.bf16.mxu1 %v730_v21  ;;  %v748_v47 = vpack.c.bf16 %v348_v44, %v346_v43  ;;  %v752_v53 = vpack.c.bf16 %v352_v50, %v350_v49 }
  0x4a   :  { %655 = vmatprep.mubr.msk.f32.mxu0 %vm836_vm0, %v837_v1  ;;  %708 = vmatpush3.bf16.msra.mxu0 %v707_v54  ;;  %v754_v54 = vpack.c.bf16 %v357_v52, %v355_v51 }
  0x4b   :  { %709 = vmatprep.subr.bf16.mxu0 %v835_v0 }
  0x4e   :  { %711 = vmatpush3.bf16.msra.mxu0 %v710_v56  ;;  %v356_v56 = vld [vmem:[#allocation4 + $0xd0] sm:$0xff] }
  0x4f   :  { %712 = vmatprep.subr.bf16.mxu0 %v835_v0  ;;  %v756_v57 = vpack.c.bf16 %v356_v56, %v354_v55 }
  0x52   :  { %714 = vmatpush3.bf16.msra.mxu0 %v713_v59 }
  0x53   :  { %715 = vmatprep.subr.bf16.mxu0 %v835_v0 }
  0x56   :  { %717 = vmatpush3.bf16.msra.mxu0 %v716_v62 }
  0x57   :  { %718 = vmatprep.subr.bf16.mxu0 %v835_v0 }
  0x5a   :  { %720 = vmatpush3.bf16.msra.mxu0 %v719_v3  ;;  %v758_v3 = vpack.c.bf16 %v361_v2, %v359_v63 }
  0x5b   :  { %721 = vmatprep.subr.bf16.mxu0 %v835_v0 }
  0x5e   :  { %723 = vmatpush3.bf16.msra.mxu0 %v722_v6  ;;  %v760_v6 = vpack.c.bf16 %v360_v5, %v358_v4 }
  0x5f   :  { %724 = vmatprep.subr.bf16.mxu0 %v835_v0 }
  0x62   :  { %726 = vmatpush3.bf16.msra.mxu0 %v725_v9 }
  0x63   :  { %727 = vmatprep.subr.bf16.mxu0 %v835_v0  ;;  %v332_v0 = vld [vmem:[#allocation4 + $0x10] sm:$0xff] }
  0x64   :  { %v732_v24 = vpack.c.bf16 %v332_v0, %v330_v20 }
  0x66   :  { %729 = vmatpush3.bf16.msra.mxu0 %v728_v17 }
 0x11c   :  { %v139_v11 = vpop.f32.mrb[0].mxu0 }
 0x11d   :  { %v140_v12 = vadd.f32 %v498_v10, %v139_v11  ;;  %v587_v13 = vpop.f32.mrb[1].mxu0 }
 0x11f   :  { %v143_v14 = vmax.f32 %v140_v12, 0.0  ;;  %v363_v12 = vlaneseq }
 0x121   :  { %621 = vmatmul.mubr.f32.vlgmr.msra.gmra.mrb[0].mxu1 %v143_v14  ;;  %v364_v13 = vshrl.u32 %v363_v12, 7 }
 0x122   :  { %437 = vmatprep.mubr.f32.mxu1 %v837_v1  ;;  %733 = vmatpush1.bf16.msra.mxu1 %v732_v24  ;;  %v736_v1 = vpack.c.bf16 %v336_v27, %v334_v26  ;;  %v46_v27 = vld [vmem:[%s948_s0 + $0x8] sm:$0xff] }
 0x123   :  { %735 = vmatprep.subr.bf16.mxu1 %v734_v25  ;;  %v365_v14 = vsub.s32 0, %v364_v13  ;;  %v369_v16 = vsub.s32 1, %v364_v13 }
 0x125   :  { %v366_v17 = vrot.slane %v50_v15, %v365_v14  ;;  %v370_v18 = vrot.slane %v50_v15, %v369_v16 }
 0x126   :  { %737 = vmatpush1.bf16.msra.mxu1 %v736_v1 }
 0x127   :  { %739 = vmatprep.subr.bf16.mxu1 %v738_v30 }
 0x12a   :  { %741 = vmatpush1.bf16.msra.mxu1 %v740_v35 }
 0x12b   :  { %743 = vmatprep.subr.bf16.mxu1 %v742_v36 }
 0x12e   :  { %745 = vmatpush1.bf16.msra.mxu1 %v744_v41 }
 0x12f   :  { %747 = vmatprep.subr.bf16.mxu1 %v746_v42 }
 0x132   :  { %749 = vmatpush1.bf16.msra.mxu1 %v748_v47 }
 0x133   :  { %751 = vmatprep.subr.bf16.mxu1 %v750_v48 }
 0x136   :  { %753 = vmatpush1.bf16.msra.mxu1 %v752_v53 }
 0x137   :  { %755 = vmatprep.subr.bf16.mxu1 %v754_v54 }
 0x13a   :  { %757 = vmatpush1.bf16.msra.mxu1 %v756_v57 }
 0x13b   :  { %759 = vmatprep.subr.bf16.mxu1 %v758_v3 }
 0x13e   :  { %761 = vmatpush1.bf16.msra.mxu1 %v760_v6 }
 0x1f4   :  { %v232_v59 = vpop.f32.mrb[0].mxu1 }
 0x1f5   :  { %v233_v60 = vadd.f32 %v499_v58, %v232_v59  ;;  %v622_v61 = vpop.f32.mrb[1].mxu1 }
 0x1f7   :  { %v236_v62 = vmax.f32 %v233_v60, 0.0 }
 0x1f9   :  { %656 = vmatmul.mubr.f32.vlgmr.msra.gmra.mrb[2].mxu0 %v236_v62 }
 0x2cc   :  { %v325_v8 = vpop.f32.mrb[2].mxu0 }
 0x2cd   :  { %v326_v9 = vadd.f32 %v500_v7, %v325_v8  ;;  %v657_v10 = vpop.f32.mrb[3].mxu0 }
 0x2cf   :  { %v329_v11 = vmax.f32 %v326_v9, 0.0 }
 0x2d1   :  { %438 = vmatmul.mubr.f32.vlgmr.msra.gmra.mrb[2].mxu1 %v329_v11 }
 0x3a4   :  { %v439_v19 = vpop.f32.mrb[2].mxu1 }
 0x3a5   :  { %v440_v20 = vadd.f32 %v439_v19, %v366_v17  ;;  %v441_v21 = vpop.f32.mrb[3].mxu1 }
 0x3a6   :  { %v442_v0 = vadd.f32 %v441_v21, %v370_v18 }
 0x3a7   :  { %488 = vst [vmem:[%s952_s4] sm:$0xff] %v440_v20 }
 0x3a8   :  { %v444_v22 = vmax.f32 %v442_v0, -20.0 }
 0x3aa   :  { %v445_v23 = vmin.f32 %v444_v22, 2.0 }
 0x3ac   :  { %v446_v24 = vmul.f32 1.442695, %v445_v23  ;;  %v448_v25 = vsub.f32 0.0, %v445_v23 }
 0x3ae   :  { %771 = vpow2.f32 %v446_v24  ;;  %v449_v26 = vmul.f32 1.442695, %v448_v25 }
 0x3b0   :  { %773 = vpow2.f32 %v449_v26 }
 0x3b8   :  { %v772_v28 = vpop.eup %771 }
 0x3b9   :  { %v451_v29 = vmul.f32 %v772_v28, %v46_v27  ;;  %489 = vst [vmem:[%s952_s4 + $0x8] sm:$0xff] %v772_v28 }
 0x3ba   :  { %v774_v34 = vpop.eup %773 }
 0x3bb   :  { %v452_v1 = vadd.f32 %v451_v29, %v440_v20 }
 0x3bd   :  { %775 = vtanh.f32 %v452_v1  ;;  %v457_v30 = vrot.slane %v452_v1, %v365_v14  ;;  %v465_v31 = vmul.f32 -2.0, %v452_v1  ;;  %v464_v52 = vsub.f32 0.6931472, %v452_v1 }
 0x3bf   :  { %v458_v32 = vsub.f32 %v457_v30, %v440_v20  ;;  %v467_v33 = vand.u32 2147483647, %v465_v31  ;;  %v466_v50 = vmax.f32 %v465_v31, 0.0 }
 0x3c1   :  { %v459_v35 = vmul.f32 %v774_v34, %v458_v32  ;;  %v468_v36 = vsub.f32 0.0, %v467_v33 }
 0x3c3   :  { %v460_v37 = vmul.f32 -0.5, %v459_v35  ;;  %v469_v38 = vmul.f32 1.442695, %v468_v36 }
 0x3c5   :  { %v461_v39 = vmul.f32 %v460_v37, %v459_v35  ;;  %777 = vpow2.f32 %v469_v38 }
 0x3c7   :  { %v776_v40 = vpop.eup %775  ;;  %v462_v41 = vsub.f32 %v461_v39, %v445_v23 }
 0x3c8   :  { %490 = vst [vmem:[%s952_s4 + $0x10] sm:$0xff] %v776_v40 }
 0x3c9   :  { %v501_v56 = vadd.f32 -0.9189385, %v462_v41 }
 0x3cf   :  { %v778_v42 = vpop.eup %777 }
 0x3d0   :  { %v471_v43 = vadd.f32 1.0, %v778_v42  ;;  %v474_v44 = vmul.f32 -0.5, %v778_v42  ;;  %v477_v46 = vand.u32 2147483647, %v778_v42 }
 0x3d2   :  { %779 = vlog2.f32 %v471_v43  ;;  %v475_v45 = vadd.f32 1.0, %v474_v44  ;;  %vm478_vm1 = vcmp.lt.f32.partialorder %v477_v46, 0.0004427343 }
 0x3d4   :  { %v476_v49 = vmul.f32 %v778_v42, %v475_v45 }
 0x3dc   :  { %v780_v47 = vpop.eup %779 }
 0x3dd   :  { %v473_v48 = vmul.f32 0.6931472, %v780_v47 }
 0x3df   :  { %v479_v51 = vsel %vm478_vm1, %v476_v49, %v473_v48 }
 0x3e0   :  { %v480_v53 = vadd.f32 %v479_v51, %v466_v50 }
 0x3e2   :  { %v481_v54 = vsub.f32 %v464_v52, %v480_v53 }
 0x3e4   :  { %v482_v55 = vmul.f32 2.0, %v481_v54 }
 0x3e6   :  { %v486_v57 = vrot.slane %v482_v55, %v365_v14 }
 0x3e8   :  { %v487_v58 = vsub.f32 %v501_v56, %v486_v57 }
 0x3ea   :  { %491 = vst [vmem:[%s952_s4 + $0x18] sm:$0xff] %v487_v58 }
 0x3eb   :  { %496 = vsyncpa [#allocation3], 1 }
 0x3ec   :  { %497 = vsyncpa [#allocation5], 1 }

</bundles_post_ra>
